<compile_context>
chip_gen: v5e
topology: v5e:2x2
jax: 0.10.0
libtpu: 0.0.40
codegen_flags: <defaults>
</compile_context>

<pallas_src>
import jax
import jax.numpy as jnp
from jax.experimental import pallas as pl
from jax.experimental.pallas import tpu as pltpu

LANE = 128  # channel padding target (vreg lane width)


# ----------------------------------------------------------------------------
# Fused Pallas kernel body
# ----------------------------------------------------------------------------
def _make_fused_kernel(block_infos, K, T, bt, cpad, cin, pad_x, pack_taps):
    """block_infos: tuple of (c_in, has_downsample) per TemporalBlock."""
    rows = bt * T

    def kernel(x_ref, *refs):
        o_ref = refs[-1]
        w = refs[:-1]

        h = x_ref[...].astype(jnp.float32)                       # (rows, cin)
        if pad_x:
            # First block has no downsample: residual needs cpad lanes too.
            h = jnp.concatenate(
                [h, jnp.zeros((rows, cpad - cin), jnp.float32)], axis=1)

        # Per-sample time index, hoisted (broadcast_in_dim is not CSE'd).
        need_mask = (bt > 1) and (K > 1)
        rowpos = (jax.lax.broadcasted_iota(jnp.int32, (rows, 1), 0) % T
                  if need_mask else None)

        def causal_conv(hx, w_ref, b_ref, dilation):
            """out[s,t] = b + sum_j W_j @ hx[s, t-(K-1-j)*d], zero left-pad.

            == Conv1d(pad=(K-1)*d, dilation=d) + Chomp1d in (T, C) layout.
            """
            c = hx.shape[1]
            taps = []
            for j in range(K):
                shift = (K - 1 - j) * dilation
                if shift == 0:
                    tap = hx
                else:
                    tap = jnp.concatenate(
                        [jnp.zeros((shift, c), hx.dtype), hx], axis=0)[:rows]
                    if need_mask:
                        # Zero rows whose shifted source belongs to the
                        # previous sample in the batch-folded layout.
                        tap = jnp.where(rowpos >= shift, tap, 0.0)
                taps.append(tap)
            if pack_taps:
                # v6e/v7x: one matmul, contraction dim K*c (matches 256 MXU).
                slab = taps[0] if K == 1 else jnp.concatenate(taps, axis=1)
                out = jnp.dot(slab.astype(jnp.bfloat16), w_ref[...],
                              preferred_element_type=jnp.float32)
            else:
                # v5e: K accumulating 128-deep dots (MXU is 128x128 anyway).
                out = jnp.zeros((rows, w_ref.shape[1]), jnp.float32)
                for j in range(K):
                    wj = w_ref[j * c:(j + 1) * c, :]
                    out = out + jnp.dot(taps[j].astype(jnp.bfloat16), wj,
                                        preferred_element_type=jnp.float32)
            return out + b_ref[...]

        idx = 0
        for i, (_c_in, has_ds) in enumerate(block_infos):
            d = 2 ** i
            w1, b1, w2, b2 = w[idx], w[idx + 1], w[idx + 2], w[idx + 3]
            idx += 4
            h1 = jnp.maximum(causal_conv(h, w1, b1, d), 0.0)
            # dropout1 / dropout2: identity at inference time.
            h2 = jnp.maximum(causal_conv(h1, w2, b2, d), 0.0)
            if has_ds:
                wd, bd = w[idx], w[idx + 1]
                idx += 2
                res = (jnp.dot(h.astype(jnp.bfloat16), wd[...],
                               preferred_element_type=jnp.float32) + bd[...])
            else:
                res = h
            h = jnp.maximum(h2 + res, 0.0)
            # TODO(synk): when T >> receptive field of the remaining blocks,
            # trim h to the trailing reachable window here (needs per-sample
            # slicing, which conflicts with the flat batch-folded layout).

        # Final FC on the last timestep of each sample (== fc(y1[:, :, -1])).
        fc_w, fc_b = w[idx], w[idx + 1]
        if bt == 1:
            last = h[rows - 1:rows, :]
        else:
            last = jnp.concatenate(
                [h[(s + 1) * T - 1:(s + 1) * T, :] for s in range(bt)], axis=0)
        o_ref[...] = (jnp.dot(last.astype(jnp.bfloat16), fc_w[...],
                              preferred_element_type=jnp.float32)
                      + fc_b[...]).astype(o_ref.dtype)

    return kernel


# ----------------------------------------------------------------------------
# One-time weight packing (hoisted out of the forward path)
# ----------------------------------------------------------------------------
def _pad_to(a, shape):
    return jnp.pad(a, [(0, s - d) for d, s in zip(a.shape, shape)])


def pack_tcn_params(params, *, kernel_size, cpad=LANE):
    """Pad channels to 128 lanes, pack K taps along the contraction dim, cast
    weights to bf16 (biases stay f32).  Done ONCE at load time."""
    K = kernel_size
    cin = params["blocks"][0]["w1"].shape[1]
    out_size = params["fc_w"].shape[-1]
    assert cin <= cpad, f"input_size {cin} > {cpad} lanes not supported"
    assert out_size <= cpad, f"output_size {out_size} > {cpad} lanes not supported"
    for blk in params["blocks"]:
        assert blk["w1"].shape[-1] <= cpad, "channel width > 128 not supported"

    blk0 = params["blocks"][0]
    pad_x = (blk0["wd"] is None) and (cin < cpad)
    c0 = cpad if pad_x else cin

    packed = {"blocks": [],
              "meta": {"K": K, "cpad": cpad, "cin": cin, "pad_x": pad_x,
                       "out_size": out_size}}
    c_in = c0
    for blk in params["blocks"]:
        pb = {
            "w1": _pad_to(blk["w1"], (K, c_in, cpad))
                  .reshape(K * c_in, cpad).astype(jnp.bfloat16),
            "b1": _pad_to(blk["b1"], (1, cpad)).astype(jnp.float32),
            "w2": _pad_to(blk["w2"], (K, cpad, cpad))
                  .reshape(K * cpad, cpad).astype(jnp.bfloat16),
            "b2": _pad_to(blk["b2"], (1, cpad)).astype(jnp.float32),
        }
        if blk["wd"] is not None:
            pb["wd"] = _pad_to(blk["wd"], (c_in, cpad)).astype(jnp.bfloat16)
            pb["bd"] = _pad_to(blk["bd"], (1, cpad)).astype(jnp.float32)
        else:
            pb["wd"] = None
            pb["bd"] = None
        packed["blocks"].append(pb)
        c_in = cpad
    packed["fc_w"] = _pad_to(params["fc_w"], (cpad, cpad)).astype(jnp.bfloat16)
    packed["fc_b"] = _pad_to(params["fc_b"], (1, cpad)).astype(jnp.float32)
    return packed


def _default_pack_taps():
    """Packed tap slab on v6e/v7x (256-wide MXU); K accumulating 128-deep dots
    on v5e/v5p (128x128 MXU)."""
    try:
        kind = jax.devices()[0].device_kind.lower()
    except Exception:
        return True
    return "v5" not in kind


# ----------------------------------------------------------------------------
# Forward wrapper
# ----------------------------------------------------------------------------
def tcn_forward(x, packed, *, pack_taps=None):
    """x: (1, B, T, input_size) -> (B, output_size).

    Matches PyTorch: x.squeeze(0).transpose(1,2) -> TCN -> fc(y1[:, :, -1]).
    """
    meta = packed["meta"]
    K, cpad, cin = meta["K"], meta["cpad"], meta["cin"]
    pad_x, out_size = meta["pad_x"], meta["out_size"]
    if pack_taps is None:
        pack_taps = _default_pack_taps()

    xb = jnp.squeeze(x, axis=0).astype(jnp.float32)              # (B, T, cin)
    B, T, _ = xb.shape

    # ---- batch folding: bt samples per grid step, >=2 steps when B >= 2 -----
    bt_cap = max(1, -(-128 // T))                 # target ~128 MXU rows / step
    tiles = min(B, max(2, -(-B // bt_cap)))       # >=2 grid steps (v7x dual TC)
    bt = -(-B // tiles)
    tiles = -(-B // bt)
    B_pad = tiles * bt
    if B_pad != B:
        xb = jnp.pad(xb, ((0, B_pad - B), (0, 0), (0, 0)))
    x_tiles = xb.reshape(tiles, bt * T, cin)      # sample-major rows per tile

    # ---- flatten args / specs ------------------------------------------------
    flat_args = [x_tiles]
    in_specs = [pl.BlockSpec((None, bt * T, cin), lambda g: (g, 0, 0))]
    block_infos = []
    c_in = cpad if pad_x else cin
    for pb in packed["blocks"]:
        flat_args += [pb["w1"], pb["b1"], pb["w2"], pb["b2"]]
        in_specs += [pl.BlockSpec(pb["w1"].shape, lambda g: (0, 0)),
                     pl.BlockSpec(pb["b1"].shape, lambda g: (0, 0)),
                     pl.BlockSpec(pb["w2"].shape, lambda g: (0, 0)),
                     pl.BlockSpec(pb["b2"].shape, lambda g: (0, 0))]
        has_ds = pb["wd"] is not None
        if has_ds:
            flat_args += [pb["wd"], pb["bd"]]
            in_specs += [pl.BlockSpec(pb["wd"].shape, lambda g: (0, 0)),
                         pl.BlockSpec(pb["bd"].shape, lambda g: (0, 0))]
        block_infos.append((c_in, has_ds))
        c_in = cpad
    flat_args += [packed["fc_w"], packed["fc_b"]]
    in_specs += [pl.BlockSpec(packed["fc_w"].shape, lambda g: (0, 0)),
                 pl.BlockSpec(packed["fc_b"].shape, lambda g: (0, 0))]
    opad = packed["fc_w"].shape[-1]

    # ---- advisory cost estimate ----------------------------------------------
    rows = bt * T
    flops = 0
    for (ci, has_ds) in block_infos:
        flops += 2 * rows * (K * ci) * cpad + 2 * rows * (K * cpad) * cpad
        if has_ds:
            flops += 2 * rows * ci * cpad
    flops += 2 * bt * cpad * opad
    flops *= tiles
    weight_bytes = sum(int(a.size) * a.dtype.itemsize for a in flat_args[1:])
    bytes_accessed = int(x_tiles.size) * 4 + weight_bytes + tiles * bt * opad * 4

    # ---- VMEM budget: double-buffered blocks + live activations + margin ------
    block_bytes = bt * T * cin * 4 + weight_bytes + bt * opad * 4
    act_bytes = rows * (K * cpad) * 4 * 6
    vmem_limit = int(min(100 << 20,
                         max(16 << 20, 2 * block_bytes + act_bytes + (4 << 20))))

    kernel = _make_fused_kernel(tuple(block_infos), K, T, bt, cpad, cin,
                                pad_x, pack_taps)

    out = pl.pallas_call(
        kernel,
        out_shape=jax.ShapeDtypeStruct((tiles, bt, opad), jnp.float32),
        grid_spec=pltpu.PrefetchScalarGridSpec(
            num_scalar_prefetch=0,
            grid=(tiles,),
            in_specs=in_specs,
            out_specs=pl.BlockSpec((None, bt, opad), lambda g: (g, 0, 0)),
        ),
        compiler_params=pltpu.CompilerParams(
            dimension_semantics=("parallel",),
            vmem_limit_bytes=vmem_limit),
        cost_estimate=pl.CostEstimate(flops=int(flops), transcendentals=0,
                                      bytes_accessed=int(bytes_accessed)),
    )(*flat_args)

    return out.reshape(tiles * bt, opad)[:B, :out_size]


# ----------------------------------------------------------------------------
# Parameter init (toy; PyTorch weight_norm omitted -- init fidelity only)
# ----------------------------------------------------------------------------
def init_tcn_params(key, input_size, output_size, num_channels, kernel_size):
    params = {"blocks": []}
    in_c = input_size
    for out_c in num_channels:
        key, k1, k2, k3, k4, k5, k6 = jax.random.split(key, 7)
        block = {
            "w1": 0.01 * jax.random.normal(k1, (kernel_size, in_c, out_c), jnp.float32),
            "b1": 0.01 * jax.random.normal(k2, (1, out_c), jnp.float32),
            "w2": 0.01 * jax.random.normal(k3, (kernel_size, out_c, out_c), jnp.float32),
            "b2": 0.01 * jax.random.normal(k4, (1, out_c), jnp.float32),
        }
        if in_c != out_c:
            block["wd"] = 0.01 * jax.random.normal(k5, (in_c, out_c), jnp.float32)
            block["bd"] = 0.01 * jax.random.normal(k6, (1, out_c), jnp.float32)
        else:
            block["wd"] = None
            block["bd"] = None
        params["blocks"].append(block)
        in_c = out_c
    key, kw, kb = jax.random.split(key, 3)
    params["fc_w"] = 0.01 * jax.random.normal(kw, (in_c, output_size), jnp.float32)
    params["fc_b"] = 0.01 * jax.random.normal(kb, (1, output_size), jnp.float32)
    return params


# ----------------------------------------------------------------------------
# Pure-JAX f32 reference for correctness checking
# ----------------------------------------------------------------------------
_HI = jax.lax.Precision.HIGHEST


def _ref_causal_conv(x, w, b, d):
    K = w.shape[0]
    T = x.shape[1]
    out = jnp.zeros(x.shape[:2] + (w.shape[-1],), jnp.float32) + b
    for j in range(K):
        off = (K - 1 - j) * d
        xs = jnp.pad(x, ((0, 0), (off, 0), (0, 0)))[:, :T, :]
        out = out + jnp.einsum("btc,cd->btd", xs, w[j], precision=_HI)
    return out


def ref_forward(x, params, *, kernel_size):
    h = jnp.squeeze(x, axis=0)
    for i, blk in enumerate(params["blocks"]):
        d = 2 ** i
        h1 = jax.nn.relu(_ref_causal_conv(h, blk["w1"], blk["b1"], d))
        h2 = jax.nn.relu(_ref_causal_conv(h1, blk["w2"], blk["b2"], d))
        if blk["wd"] is None:
            res = h
        else:
            res = jnp.einsum("btc,cd->btd", h, blk["wd"], precision=_HI) + blk["bd"]
        h = jax.nn.relu(h2 + res)
    return (jnp.dot(h[:, -1, :], params["fc_w"], precision=_HI)
            + params["fc_b"])


# ----------------------------------------------------------------------------
if __name__ == "__main__":
    input_size = 4
    output_size = 3
    num_channels = [8, 8]
    kernel_size = 2
    B, T = 8, 16          # B=8 exercises batch folding (bt=4) with 2 grid steps

    key = jax.random.PRNGKey(0)
    key, kx = jax.random.split(key)
    x = jax.random.normal(kx, (1, B, T, input_size), jnp.float32)

    params = init_tcn_params(key, input_size, output_size, num_channels, kernel_size)
    packed = pack_tcn_params(params, kernel_size=kernel_size)   # once, at load time

    out = tcn_forward(x, packed)
    out = jax.block_until_ready(out)

    ref = ref_forward(x, params, kernel_size=kernel_size)
    assert out.shape == (B, output_size), out.shape
    # Tolerance accounts for bf16 weight/activation storage (f32 accumulation).
    assert jnp.allclose(out, ref, atol=1e-3, rtol=2e-2), (out, ref)

    print("KERNEL_OK")
</pallas_src>

<mosaic_0001>
module attributes {stable_mosaic.version = 11 : i64} {
  func.func @kernel(%arg0: i32, %arg1: memref<1x64x4xf32, #tpu.memory_space<vmem>>, %arg2: memref<8x128xbf16, #tpu.memory_space<vmem>>, %arg3: memref<1x128xf32, #tpu.memory_space<vmem>>, %arg4: memref<256x128xbf16, #tpu.memory_space<vmem>>, %arg5: memref<1x128xf32, #tpu.memory_space<vmem>>, %arg6: memref<4x128xbf16, #tpu.memory_space<vmem>>, %arg7: memref<1x128xf32, #tpu.memory_space<vmem>>, %arg8: memref<256x128xbf16, #tpu.memory_space<vmem>>, %arg9: memref<1x128xf32, #tpu.memory_space<vmem>>, %arg10: memref<256x128xbf16, #tpu.memory_space<vmem>>, %arg11: memref<1x128xf32, #tpu.memory_space<vmem>>, %arg12: memref<128x128xbf16, #tpu.memory_space<vmem>>, %arg13: memref<1x128xf32, #tpu.memory_space<vmem>>, %arg14: memref<1x4x128xf32, #tpu.memory_space<vmem>>) attributes {dimension_semantics = [#tpu.dimension_semantics<parallel>], iteration_bounds = array<i64: 2>, scalar_prefetch = 0 : i64, scratch_operands = 0 : i64, tpu.core_type = #tpu.core_type<tc>, window_params = [{transform_indices = @transform_0, window_bounds = array<i64: 1, 64, 4>}, {pipeline_mode = #tpu.pipeline_mode<synchronous>, transform_indices = @transform_1, window_bounds = array<i64: 8, 128>}, {pipeline_mode = #tpu.pipeline_mode<synchronous>, transform_indices = @transform_2, window_bounds = array<i64: 1, 128>}, {pipeline_mode = #tpu.pipeline_mode<synchronous>, transform_indices = @transform_3, window_bounds = array<i64: 256, 128>}, {pipeline_mode = #tpu.pipeline_mode<synchronous>, transform_indices = @transform_4, window_bounds = array<i64: 1, 128>}, {pipeline_mode = #tpu.pipeline_mode<synchronous>, transform_indices = @transform_5, window_bounds = array<i64: 4, 128>}, {pipeline_mode = #tpu.pipeline_mode<synchronous>, transform_indices = @transform_6, window_bounds = array<i64: 1, 128>}, {pipeline_mode = #tpu.pipeline_mode<synchronous>, transform_indices = @transform_7, window_bounds = array<i64: 256, 128>}, {pipeline_mode = #tpu.pipeline_mode<synchronous>, transform_indices = @transform_8, window_bounds = array<i64: 1, 128>}, {pipeline_mode = #tpu.pipeline_mode<synchronous>, transform_indices = @transform_9, window_bounds = array<i64: 256, 128>}, {pipeline_mode = #tpu.pipeline_mode<synchronous>, transform_indices = @transform_10, window_bounds = array<i64: 1, 128>}, {pipeline_mode = #tpu.pipeline_mode<synchronous>, transform_indices = @transform_11, window_bounds = array<i64: 128, 128>}, {pipeline_mode = #tpu.pipeline_mode<synchronous>, transform_indices = @transform_12, window_bounds = array<i64: 1, 128>}, {transform_indices = @transform_13, window_bounds = array<i64: 1, 4, 128>}]} {
    %c0 = arith.constant 0 : index
    %c0_0 = arith.constant 0 : index
    %c0_1 = arith.constant 0 : index
    %0 = vector.load %arg1[%c0, %c0_0, %c0_1] : memref<1x64x4xf32, #tpu.memory_space<vmem>>, vector<1x64x4xf32>
    %1 = vector.shape_cast %0 : vector<1x64x4xf32> to vector<64x4xf32>
    %2 = tpu.iota {dimensions = array<i32: 0>} : vector<64x1xi32>
    %c16_i32 = arith.constant 16 : i32
    %c0_i32 = arith.constant 0 : i32
    %3 = arith.cmpi eq, %c16_i32, %c0_i32 : i32
    %c1_i32 = arith.constant 1 : i32
    %4 = arith.select %3, %c1_i32, %c16_i32 : i32
    %5 = vector.broadcast %4 : i32 to vector<64x1xi32>
    %6 = arith.remsi %2, %5 : vector<64x1xi32>
    %c0_i32_2 = arith.constant 0 : i32
    %7 = vector.broadcast %c0_i32_2 : i32 to vector<64x1xi32>
    %8 = arith.cmpi ne, %6, %7 : vector<64x1xi32>
    %c0_i32_3 = arith.constant 0 : i32
    %9 = vector.broadcast %c0_i32_3 : i32 to vector<64x1xi32>
    %10 = arith.cmpi slt, %6, %9 : vector<64x1xi32>
    %c0_i32_4 = arith.constant 0 : i32
    %11 = arith.cmpi slt, %4, %c0_i32_4 : i32
    %12 = vector.broadcast %11 : i1 to vector<64x1xi1>
    %13 = vector.broadcast %12 : vector<64x1xi1> to vector<64x1xi1>
    %14 = arith.xori %10, %13 : vector<64x1xi1>
    %15 = arith.andi %14, %8 : vector<64x1xi1>
    %16 = vector.broadcast %4 : i32 to vector<64x1xi32>
    %17 = arith.addi %6, %16 : vector<64x1xi32>
    %18 = arith.select %15, %17, %6 : vector<64x1xi1>, vector<64x1xi32>
    %cst = arith.constant 0.000000e+00 : f32
    %19 = vector.broadcast %cst : f32 to vector<1x4xf32>
    %20 = tpu.concatenate %19, %1 in 0 : vector<1x4xf32>, vector<64x4xf32> -> vector<65x4xf32>
    %21 = vector.extract_strided_slice %20 {offsets = [0, 0], sizes = [64, 4], strides = [1, 1]} : vector<65x4xf32> to vector<64x4xf32>
    %c1_i32_5 = arith.constant 1 : i32
    %22 = vector.broadcast %c1_i32_5 : i32 to vector<64x1xi32>
    %23 = arith.cmpi sge, %18, %22 : vector<64x1xi32>
    %cst_6 = arith.constant 0.000000e+00 : f32
    %24 = vector.shape_cast %23 : vector<64x1xi1> to vector<64x1xi1>
    %25 = vector.broadcast %24 : vector<64x1xi1> to vector<64x4xi1>
    %26 = vector.broadcast %cst_6 : f32 to vector<64x4xf32>
    %27 = arith.select %25, %21, %26 : vector<64x4xi1>, vector<64x4xf32>
    %28 = tpu.concatenate %27, %1 in 1 : vector<64x4xf32>, vector<64x4xf32> -> vector<64x8xf32>
    %29 = arith.truncf %28 : vector<64x8xf32> to vector<64x8xbf16>
    %c0_7 = arith.constant 0 : index
    %c0_8 = arith.constant 0 : index
    %30 = vector.load %arg2[%c0_7, %c0_8] : memref<8x128xbf16, #tpu.memory_space<vmem>>, vector<8x128xbf16>
    %cst_9 = arith.constant dense<0.000000e+00> : vector<64x128xf32>
    %31 = tpu.matmul %29, %30, %cst_9 {dimension_numbers = #tpu.dot_dimension_numbers<[1], [0], [0], [1], [0, 0, 1, 1], [], []>} : vector<64x8xbf16>, vector<8x128xbf16>, vector<64x128xf32> -> vector<64x128xf32>
    %c0_10 = arith.constant 0 : index
    %c0_11 = arith.constant 0 : index
    %32 = vector.load %arg3[%c0_10, %c0_11] : memref<1x128xf32, #tpu.memory_space<vmem>>, vector<1x128xf32>
    %33 = vector.broadcast %32 : vector<1x128xf32> to vector<64x128xf32>
    %34 = arith.addf %31, %33 : vector<64x128xf32>
    %cst_12 = arith.constant 0.000000e+00 : f32
    %35 = vector.broadcast %cst_12 : f32 to vector<64x128xf32>
    %36 = arith.maximumf %34, %35 : vector<64x128xf32>
    %cst_13 = arith.constant 0.000000e+00 : f32
    %37 = vector.broadcast %cst_13 : f32 to vector<1x128xf32>
    %38 = tpu.concatenate %37, %36 in 0 : vector<1x128xf32>, vector<64x128xf32> -> vector<65x128xf32>
    %39 = vector.extract_strided_slice %38 {offsets = [0, 0], sizes = [64, 128], strides = [1, 1]} : vector<65x128xf32> to vector<64x128xf32>
    %c1_i32_14 = arith.constant 1 : i32
    %40 = vector.broadcast %c1_i32_14 : i32 to vector<64x1xi32>
    %41 = arith.cmpi sge, %18, %40 : vector<64x1xi32>
    %cst_15 = arith.constant 0.000000e+00 : f32
    %42 = vector.shape_cast %41 : vector<64x1xi1> to vector<64x1xi1>
    %43 = vector.broadcast %42 : vector<64x1xi1> to vector<64x128xi1>
    %44 = vector.broadcast %cst_15 : f32 to vector<64x128xf32>
    %45 = arith.select %43, %39, %44 : vector<64x128xi1>, vector<64x128xf32>
    %46 = tpu.concatenate %45, %36 in 1 : vector<64x128xf32>, vector<64x128xf32> -> vector<64x256xf32>
    %47 = arith.truncf %46 : vector<64x256xf32> to vector<64x256xbf16>
    %c0_16 = arith.constant 0 : index
    %c0_17 = arith.constant 0 : index
    %48 = vector.load %arg4[%c0_16, %c0_17] : memref<256x128xbf16, #tpu.memory_space<vmem>>, vector<256x128xbf16>
    %cst_18 = arith.constant dense<0.000000e+00> : vector<64x128xf32>
    %49 = tpu.matmul %47, %48, %cst_18 {dimension_numbers = #tpu.dot_dimension_numbers<[1], [0], [0], [1], [0, 0, 1, 1], [], []>} : vector<64x256xbf16>, vector<256x128xbf16>, vector<64x128xf32> -> vector<64x128xf32>
    %c0_19 = arith.constant 0 : index
    %c0_20 = arith.constant 0 : index
    %50 = vector.load %arg5[%c0_19, %c0_20] : memref<1x128xf32, #tpu.memory_space<vmem>>, vector<1x128xf32>
    %51 = vector.broadcast %50 : vector<1x128xf32> to vector<64x128xf32>
    %52 = arith.addf %49, %51 : vector<64x128xf32>
    %cst_21 = arith.constant 0.000000e+00 : f32
    %53 = vector.broadcast %cst_21 : f32 to vector<64x128xf32>
    %54 = arith.maximumf %52, %53 : vector<64x128xf32>
    %55 = arith.truncf %1 : vector<64x4xf32> to vector<64x4xbf16>
    %c0_22 = arith.constant 0 : index
    %c0_23 = arith.constant 0 : index
    %56 = vector.load %arg6[%c0_22, %c0_23] : memref<4x128xbf16, #tpu.memory_space<vmem>>, vector<4x128xbf16>
    %cst_24 = arith.constant dense<0.000000e+00> : vector<64x128xf32>
    %57 = tpu.matmul %55, %56, %cst_24 {dimension_numbers = #tpu.dot_dimension_numbers<[1], [0], [0], [1], [0, 0, 1, 1], [], []>} : vector<64x4xbf16>, vector<4x128xbf16>, vector<64x128xf32> -> vector<64x128xf32>
    %c0_25 = arith.constant 0 : index
    %c0_26 = arith.constant 0 : index
    %58 = vector.load %arg7[%c0_25, %c0_26] : memref<1x128xf32, #tpu.memory_space<vmem>>, vector<1x128xf32>
    %59 = vector.broadcast %58 : vector<1x128xf32> to vector<64x128xf32>
    %60 = arith.addf %57, %59 : vector<64x128xf32>
    %61 = arith.addf %54, %60 : vector<64x128xf32>
    %cst_27 = arith.constant 0.000000e+00 : f32
    %62 = vector.broadcast %cst_27 : f32 to vector<64x128xf32>
    %63 = arith.maximumf %61, %62 : vector<64x128xf32>
    %cst_28 = arith.constant 0.000000e+00 : f32
    %64 = vector.broadcast %cst_28 : f32 to vector<2x128xf32>
    %65 = tpu.concatenate %64, %63 in 0 : vector<2x128xf32>, vector<64x128xf32> -> vector<66x128xf32>
    %66 = vector.extract_strided_slice %65 {offsets = [0, 0], sizes = [64, 128], strides = [1, 1]} : vector<66x128xf32> to vector<64x128xf32>
    %c2_i32 = arith.constant 2 : i32
    %67 = vector.broadcast %c2_i32 : i32 to vector<64x1xi32>
    %68 = arith.cmpi sge, %18, %67 : vector<64x1xi32>
    %cst_29 = arith.constant 0.000000e+00 : f32
    %69 = vector.shape_cast %68 : vector<64x1xi1> to vector<64x1xi1>
    %70 = vector.broadcast %69 : vector<64x1xi1> to vector<64x128xi1>
    %71 = vector.broadcast %cst_29 : f32 to vector<64x128xf32>
    %72 = arith.select %70, %66, %71 : vector<64x128xi1>, vector<64x128xf32>
    %73 = tpu.concatenate %72, %63 in 1 : vector<64x128xf32>, vector<64x128xf32> -> vector<64x256xf32>
    %74 = arith.truncf %73 : vector<64x256xf32> to vector<64x256xbf16>
    %c0_30 = arith.constant 0 : index
    %c0_31 = arith.constant 0 : index
    %75 = vector.load %arg8[%c0_30, %c0_31] : memref<256x128xbf16, #tpu.memory_space<vmem>>, vector<256x128xbf16>
    %cst_32 = arith.constant dense<0.000000e+00> : vector<64x128xf32>
    %76 = tpu.matmul %74, %75, %cst_32 {dimension_numbers = #tpu.dot_dimension_numbers<[1], [0], [0], [1], [0, 0, 1, 1], [], []>} : vector<64x256xbf16>, vector<256x128xbf16>, vector<64x128xf32> -> vector<64x128xf32>
    %c0_33 = arith.constant 0 : index
    %c0_34 = arith.constant 0 : index
    %77 = vector.load %arg9[%c0_33, %c0_34] : memref<1x128xf32, #tpu.memory_space<vmem>>, vector<1x128xf32>
    %78 = vector.broadcast %77 : vector<1x128xf32> to vector<64x128xf32>
    %79 = arith.addf %76, %78 : vector<64x128xf32>
    %cst_35 = arith.constant 0.000000e+00 : f32
    %80 = vector.broadcast %cst_35 : f32 to vector<64x128xf32>
    %81 = arith.maximumf %79, %80 : vector<64x128xf32>
    %cst_36 = arith.constant 0.000000e+00 : f32
    %82 = vector.broadcast %cst_36 : f32 to vector<2x128xf32>
    %83 = tpu.concatenate %82, %81 in 0 : vector<2x128xf32>, vector<64x128xf32> -> vector<66x128xf32>
    %84 = vector.extract_strided_slice %83 {offsets = [0, 0], sizes = [64, 128], strides = [1, 1]} : vector<66x128xf32> to vector<64x128xf32>
    %c2_i32_37 = arith.constant 2 : i32
    %85 = vector.broadcast %c2_i32_37 : i32 to vector<64x1xi32>
    %86 = arith.cmpi sge, %18, %85 : vector<64x1xi32>
    %cst_38 = arith.constant 0.000000e+00 : f32
    %87 = vector.shape_cast %86 : vector<64x1xi1> to vector<64x1xi1>
    %88 = vector.broadcast %87 : vector<64x1xi1> to vector<64x128xi1>
    %89 = vector.broadcast %cst_38 : f32 to vector<64x128xf32>
    %90 = arith.select %88, %84, %89 : vector<64x128xi1>, vector<64x128xf32>
    %91 = tpu.concatenate %90, %81 in 1 : vector<64x128xf32>, vector<64x128xf32> -> vector<64x256xf32>
    %92 = arith.truncf %91 : vector<64x256xf32> to vector<64x256xbf16>
    %c0_39 = arith.constant 0 : index
    %c0_40 = arith.constant 0 : index
    %93 = vector.load %arg10[%c0_39, %c0_40] : memref<256x128xbf16, #tpu.memory_space<vmem>>, vector<256x128xbf16>
    %cst_41 = arith.constant dense<0.000000e+00> : vector<64x128xf32>
    %94 = tpu.matmul %92, %93, %cst_41 {dimension_numbers = #tpu.dot_dimension_numbers<[1], [0], [0], [1], [0, 0, 1, 1], [], []>} : vector<64x256xbf16>, vector<256x128xbf16>, vector<64x128xf32> -> vector<64x128xf32>
    %c0_42 = arith.constant 0 : index
    %c0_43 = arith.constant 0 : index
    %95 = vector.load %arg11[%c0_42, %c0_43] : memref<1x128xf32, #tpu.memory_space<vmem>>, vector<1x128xf32>
    %96 = vector.broadcast %95 : vector<1x128xf32> to vector<64x128xf32>
    %97 = arith.addf %94, %96 : vector<64x128xf32>
    %cst_44 = arith.constant 0.000000e+00 : f32
    %98 = vector.broadcast %cst_44 : f32 to vector<64x128xf32>
    %99 = arith.maximumf %97, %98 : vector<64x128xf32>
    %100 = arith.addf %99, %63 : vector<64x128xf32>
    %cst_45 = arith.constant 0.000000e+00 : f32
    %101 = vector.broadcast %cst_45 : f32 to vector<64x128xf32>
    %102 = arith.maximumf %100, %101 : vector<64x128xf32>
    %103 = vector.extract_strided_slice %102 {offsets = [15, 0], sizes = [1, 128], strides = [1, 1]} : vector<64x128xf32> to vector<1x128xf32>
    %104 = vector.extract_strided_slice %102 {offsets = [31, 0], sizes = [1, 128], strides = [1, 1]} : vector<64x128xf32> to vector<1x128xf32>
    %105 = vector.extract_strided_slice %102 {offsets = [47, 0], sizes = [1, 128], strides = [1, 1]} : vector<64x128xf32> to vector<1x128xf32>
    %106 = vector.extract_strided_slice %102 {offsets = [63, 0], sizes = [1, 128], strides = [1, 1]} : vector<64x128xf32> to vector<1x128xf32>
    %107 = tpu.concatenate %103, %104, %105, %106 in 0 : vector<1x128xf32>, vector<1x128xf32>, vector<1x128xf32>, vector<1x128xf32> -> vector<4x128xf32>
    %108 = arith.truncf %107 : vector<4x128xf32> to vector<4x128xbf16>
    %c0_46 = arith.constant 0 : index
    %c0_47 = arith.constant 0 : index
    %109 = vector.load %arg12[%c0_46, %c0_47] : memref<128x128xbf16, #tpu.memory_space<vmem>>, vector<128x128xbf16>
    %cst_48 = arith.constant dense<0.000000e+00> : vector<4x128xf32>
    %110 = tpu.matmul %108, %109, %cst_48 {dimension_numbers = #tpu.dot_dimension_numbers<[1], [0], [0], [1], [0, 0, 1, 1], [], []>} : vector<4x128xbf16>, vector<128x128xbf16>, vector<4x128xf32> -> vector<4x128xf32>
    %c0_49 = arith.constant 0 : index
    %c0_50 = arith.constant 0 : index
    %111 = vector.load %arg13[%c0_49, %c0_50] : memref<1x128xf32, #tpu.memory_space<vmem>>, vector<1x128xf32>
    %112 = vector.broadcast %111 : vector<1x128xf32> to vector<4x128xf32>
    %113 = arith.addf %110, %112 : vector<4x128xf32>
    %c0_51 = arith.constant 0 : index
    %c0_52 = arith.constant 0 : index
    %c0_53 = arith.constant 0 : index
    %114 = vector.load %arg14[%c0_51, %c0_52, %c0_53] : memref<1x4x128xf32, #tpu.memory_space<vmem>>, vector<1x4x128xf32>
    %115 = vector.shape_cast %114 : vector<1x4x128xf32> to vector<4x128xf32>
    %116 = vector.shape_cast %113 : vector<4x128xf32> to vector<1x4x128xf32>
    tpu.vector_store %arg14[%c0_51, %c0_52, %c0_53], %116 {strides = array<i32>} : memref<1x4x128xf32, #tpu.memory_space<vmem>>, vector<1x4x128xf32>,
    return
  }
  func.func @transform_0(%arg0: i32) -> (i32, i32, i32) {
    %c0_i32 = arith.constant 0 : i32
    %c0_i32_0 = arith.constant 0 : i32
    %c0_i32_1 = arith.constant 0 : i32
    return %arg0, %c0_i32, %c0_i32_0 : i32, i32, i32
  }
  func.func @transform_1(%arg0: i32) -> (i32, i32) {
    %c0_i32 = arith.constant 0 : i32
    %c0_i32_0 = arith.constant 0 : i32
    %c0_i32_1 = arith.constant 0 : i32
    return %c0_i32, %c0_i32_0 : i32, i32
  }
  func.func @transform_2(%arg0: i32) -> (i32, i32) {
    %c0_i32 = arith.constant 0 : i32
    %c0_i32_0 = arith.constant 0 : i32
    %c0_i32_1 = arith.constant 0 : i32
    return %c0_i32, %c0_i32_0 : i32, i32
  }
  func.func @transform_3(%arg0: i32) -> (i32, i32) {
    %c0_i32 = arith.constant 0 : i32
    %c0_i32_0 = arith.constant 0 : i32
    %c0_i32_1 = arith.constant 0 : i32
    return %c0_i32, %c0_i32_0 : i32, i32
  }
  func.func @transform_4(%arg0: i32) -> (i32, i32) {
    %c0_i32 = arith.constant 0 : i32
    %c0_i32_0 = arith.constant 0 : i32
    %c0_i32_1 = arith.constant 0 : i32
    return %c0_i32, %c0_i32_0 : i32, i32
  }
  func.func @transform_5(%arg0: i32) -> (i32, i32) {
    %c0_i32 = arith.constant 0 : i32
    %c0_i32_0 = arith.constant 0 : i32
    %c0_i32_1 = arith.constant 0 : i32
    return %c0_i32, %c0_i32_0 : i32, i32
  }
  func.func @transform_6(%arg0: i32) -> (i32, i32) {
    %c0_i32 = arith.constant 0 : i32
    %c0_i32_0 = arith.constant 0 : i32
    %c0_i32_1 = arith.constant 0 : i32
    return %c0_i32, %c0_i32_0 : i32, i32
  }
  func.func @transform_7(%arg0: i32) -> (i32, i32) {
    %c0_i32 = arith.constant 0 : i32
    %c0_i32_0 = arith.constant 0 : i32
    %c0_i32_1 = arith.constant 0 : i32
    return %c0_i32, %c0_i32_0 : i32, i32
  }
  func.func @transform_8(%arg0: i32) -> (i32, i32) {
    %c0_i32 = arith.constant 0 : i32
    %c0_i32_0 = arith.constant 0 : i32
    %c0_i32_1 = arith.constant 0 : i32
    return %c0_i32, %c0_i32_0 : i32, i32
  }
  func.func @transform_9(%arg0: i32) -> (i32, i32) {
    %c0_i32 = arith.constant 0 : i32
    %c0_i32_0 = arith.constant 0 : i32
    %c0_i32_1 = arith.constant 0 : i32
    return %c0_i32, %c0_i32_0 : i32, i32
  }
  func.func @transform_10(%arg0: i32) -> (i32, i32) {
    %c0_i32 = arith.constant 0 : i32
    %c0_i32_0 = arith.constant 0 : i32
    %c0_i32_1 = arith.constant 0 : i32
    return %c0_i32, %c0_i32_0 : i32, i32
  }
  func.func @transform_11(%arg0: i32) -> (i32, i32) {
    %c0_i32 = arith.constant 0 : i32
    %c0_i32_0 = arith.constant 0 : i32
    %c0_i32_1 = arith.constant 0 : i32
    return %c0_i32, %c0_i32_0 : i32, i32
  }
  func.func @transform_12(%arg0: i32) -> (i32, i32) {
    %c0_i32 = arith.constant 0 : i32
    %c0_i32_0 = arith.constant 0 : i32
    %c0_i32_1 = arith.constant 0 : i32
    return %c0_i32, %c0_i32_0 : i32, i32
  }
  func.func @transform_13(%arg0: i32) -> (i32, i32, i32) {
    %c0_i32 = arith.constant 0 : i32
    %c0_i32_0 = arith.constant 0 : i32
    %c0_i32_1 = arith.constant 0 : i32
    return %arg0, %c0_i32, %c0_i32_0 : i32, i32, i32
  }
}

</mosaic_0001>

<bundles_post_ra>
// kernel: tpu_custom_call.1
= control target key start
LH: loop header
LB: loop body
LE: loop exit
PB: predicated region body
PF: predicated region fallthrough
CT: control target
= control target key end

     0   :  { %s2917_s0 = inlined_call_operand.vmem [shape: f32[2,64,4], index: 0, kind: input, shape index: {}]   ;;  %s2918_s1 = inlined_call_operand.vmem [shape: bf16[8,128], index: 1, kind: input, shape index: {}]   ;;  %s2919_s2 = inlined_call_operand.vmem [shape: f32[1,128], index: 2, kind: input, shape index: {}]   ;;  %s2920_s3 = inlined_call_operand.vmem [shape: bf16[256,128], index: 3, kind: input, shape index: {}]   ;;  %s2921_s4 = inlined_call_operand.vmem [shape: f32[1,128], index: 4, kind: input, shape index: {}]   ;;  %s2922_s5 = inlined_call_operand.vmem [shape: bf16[4,128], index: 5, kind: input, shape index: {}]   ;;  %s2923_s6 = inlined_call_operand.vmem [shape: f32[1,128], index: 6, kind: input, shape index: {}]   ;;  %s2924_s7 = inlined_call_operand.hbm [shape: bf16[256,128], index: 7, kind: input, shape index: {}]   ;;  %s2925_s8 = inlined_call_operand.vmem [shape: f32[1,128], index: 8, kind: input, shape index: {}]   ;;  %s2926_s9 = inlined_call_operand.hbm [shape: bf16[256,128], index: 9, kind: input, shape index: {}]   ;;  %s2927_s10 = inlined_call_operand.vmem [shape: f32[1,128], index: 10, kind: input, shape index: {}]   ;;  %s2928_s11 = inlined_call_operand.hbm [shape: bf16[128,128], index: 11, kind: input, shape index: {}]   ;;  %s2929_s12 = inlined_call_operand.vmem [shape: f32[1,128], index: 12, kind: input, shape index: {}]   ;;  %s2930_s13 = inlined_call_operand.hbm [shape: f32[2,4,128], index: 13, kind: output, shape index: {}]  }
   0x1   :  { %2936 = sst [smem:[#allocation17_spill]] %s2924_s7 }
   0x2   :  { %2937 = sst [smem:[#allocation18_spill]] %s2926_s9 }
   0x3   :  { %18 = vsyncpa [#allocation3], 0 }
   0x4   :  { %19 = vsyncpa [#allocation6], 0 }
   0x5   :  { %20 = vsyncpa [#allocation4], 0 }
   0x6   :  { %22 = vsyncpa [#allocation4 + $0x1], 0  ;;  %s2478_s25 = smov 0   ;;  %s2480_s26 = smov 0  }
   0x7   :  { %s2482_s27 = smov 0   ;;  %s2484_s28 = smov 0  }
   0x8 LB: > { %2938 = sst [smem:[#allocation12_spill]] %s2387_s25  ;;  %s2499_s29 = sadd.s32 4294967295, %s2399_s28   ;;  %s2399_s28 = sphi %s2484_s28, %s2967_s28   ;;  %s2395_s27 = sphi %s2482_s27, %s2969_s27   ;;  %s2391_s26 = sphi %s2480_s26, %s2971_s26   ;;  %s2387_s25 = sphi %s2478_s25, %s2970_s25  }
   0x9   : > { %2939 = sst [smem:[#allocation13_spill]] %s2395_s27  ;;  %s1797_s30 = sadd.s32 4294967294, %s2399_s28  }
   0xa   : > { %s2503_s14 = sadd.s32 1, %s2399_s28   ;;  %s313_s15 = sadd.s32 1, %s2395_s27 }
   0xb   : > { %2940 = sst [smem:[#allocation14_spill]] %s2503_s14  ;;  %s310_s16 = ssub.s32 %s2399_s28, %s2503_s14 }
   0xc   : > { %p323_p0 = scmp.ne.s32.totalorder %s2395_s27, %s2391_s26  ;;  %p311_p1 = scmp.eq.s32.totalorder %s310_s16, 0 }
   0xd   : > { %p324_p2 = scmp.eq.s32.totalorder %s2499_s29, 1  ;;  %p329_p3 = scmp.ne.s32.totalorder %s2391_s26, %s2387_s25 }
   0xe   : > { %p330_p4 = scmp.eq.s32.totalorder %s1797_s30, 1  ;;  %p1798_p7 = scmp.ge.s32.totalorder %s2399_s28, 1 }
   0xf   : > { %s2514_s17 = scalar_select %p311_p1, %s2395_s27, %s313_s15  }
  0x10   : > { %p2516_p5 = por %p324_p2, %p323_p0  ;;  %p2520_p6 = por %p330_p4, %p329_p3 }
  0x11   : > { %2941 = sst [smem:[#allocation15_spill]] %s2514_s17  ;;  %p337_p8 = scmp.lt.s32.totalorder %s2399_s28, 3 }
  0x12   : > { %s2943_s19 = scalar_select %p2520_p6, 1, 0 }
  0x13   : > { %p2167_p9 = scmp.eq.s32.totalorder %s2499_s29, 0  ;;  %p2527_p10 = pnand %p1798_p7, %p337_p8 }
  0x14   : > { %2944 = sst [smem:[#allocation16_spill]] %s2943_s19  ;;  %s2401_s17 = smov [#allocation5]  }
  0x15   : > { %s2946_s9 = sld [smem:[#allocation18_spill]]  ;;  %p2153_p11 = pneg %p2527_p10 }
  0x16   : > { %s2947_s7 = sld [smem:[#allocation17_spill]]  ;;  %s385_s27 = sshll.u32 %s2401_s17, 4  ;;  %s386_s27 = int_to_ptr.vmem [resolvable:$true] %s385_s27 }
  0x17   : > { %p2541_p12 = pnand %p2167_p9, %p2153_p11  ;;  %s2402_s21 = smov 64  }
  0x18   : > { %s2403_s22 = smov 4   ;;  %s2405_s19 = smov [#allocation7]  }
  0x19   : > { %s402_s25 = sshll.u32 %s2405_s19, 4  ;;  %s403_s25 = int_to_ptr.vmem [resolvable:$true] %s402_s25 }
  0x1b   : > { %s383_s23 = sshll.u32 %s2946_s9, 4  ;;  %s2404_s9 = smov [#allocation2]   ;;  %s384_s23 = int_to_ptr.hbm [resolvable:$true] %s383_s23 }
  0x1c   : > { %s366_s15 = sshll.u32 %s2947_s7, 4  ;;  %s368_s14 = sshll.u32 %s2404_s9, 4  ;;  %s367_s15 = int_to_ptr.hbm [resolvable:$true] %s366_s15  ;;  %s369_s14 = int_to_ptr.vmem [resolvable:$true] %s368_s14 }
  0x1d   : > { %2159 = dma.hbm_to_vmem [thread:$0]  (!%p2541_p12), %s384_s23, 2048, %s386_s27, [#allocation6], %s2402_s21, %s2402_s21, %s2403_s22  }
  0x1e   : > { %s400_s7 = sshll.u32 %s2928_s11, 4  ;;  %429 = sbr.rel (%p2527_p10) target bundleno = 938 (0x3aa), region = 72  ;;  %s401_s7 = int_to_ptr.hbm [resolvable:$true] %s400_s7 }
  0x1f   : > { %2156 = dma.hbm_to_vmem [thread:$0]  (!%p2541_p12), %s367_s15, 2048, %s369_s14, [#allocation3], %s2402_s21, %s2402_s21, %s2403_s22  }
  0x20   : > { %2162 = dma.hbm_to_vmem [thread:$0]  (!%p2541_p12), %s401_s7, 1024, %s403_s25, [#allocation6], %s2402_s21, %s2402_s21, %s2403_s22  }
  0x23   : > { %2374 = dma.done.wait (%p2167_p9), [#allocation3], 2048  }
  0x24   : > { %2376 = vsyncadd (%p2167_p9), [#allocation3], 4294965248 }
  0x25   : > { %2378 = dma.done.wait (%p2167_p9), [#allocation6], 3072  }
  0x26   : > { %2380 = vsyncadd (%p2167_p9), [#allocation6], 4294964224  ;;  %p484_p13 = scmp.lt.s32.totalorder %s2499_s29, 1  ;;  %s2406_s17 = smov 4   ;;  %v705_v12 = vld [vmem:[%s2918_s1] sm:$0xf]  ;;  %v498_v14 = vlaneseq }
  0x27   : > { %vm723_vm0 = vcmask 1043456   ;;  %vm611_vm1 = vcmask 1040384   ;;  %vm692_vm3 = vcmask 31744   ;;  %vm710_vm4 = vcmask 64512   ;;  %v2098_v46 = vld [vmem:[%s2920_s3 + $0x78] sm:$0xff]  ;;  %v2097_v50 = vld [vmem:[%s2920_s3 + $0x70] sm:$0xff] }
  0x28   : > { %s485_s9 = scalar_select %p484_p13, %s2499_s29, 1  ;;  %v725_v13 = vsel %vm723_vm0, %v705_v12, 0  ;;  %v2596_v15 = vshrl.u32 %v498_v14, 7  ;;  %v2090_v47 = vld [vmem:[%s2920_s3 + $0x38] sm:$0xff]  ;;  %973 = vmatpush.bf16.msra.mxu2 %v2098_v46  ;;  %v2089_v51 = vld [vmem:[%s2920_s3 + $0x30] sm:$0xff]  ;;  %v2096_v58 = vld [vmem:[%s2920_s3 + $0x68] sm:$0xff] }
  0x29   : > { %734 = vmatpush.bf16.msra.mxu0 %v725_v13  ;;  %944 = vmatpush.bf16.msra.mxu1 %v2090_v47  ;;  %v2088_v59 = vld [vmem:[%s2920_s3 + $0x28] sm:$0xff]  ;;  %v2095_v62 = vld [vmem:[%s2920_s3 + $0x60] sm:$0xff]  ;;  %vm1031_vm8 = vcmask 1041408   ;;  %vm2407_vm9 = vmmov 1   ;;  %s481_s20 = sand.u32 1, %s2391_s26   ;;  %s2079_s23 = sshll.u32 %s2499_s29, 2 }
  0x2a   : > { %s2082_s7 = sshll.u32 %s485_s9, 6  ;;  %v511_v17 = vand.u32 15, %v2596_v15  ;;  %v2612_v26 = vadd.s32 16, %v2596_v15  ;;  %v2633_v42 = vadd.s32 32, %v2596_v15  ;;  %v2087_v63 = vld [vmem:[%s2920_s3 + $0x20] sm:$0xff]  ;;  %s1807_s15 = sshll.u32 %s481_s20, 2 }
  0x2b   : > { %s488_s14 = scalar_lea.vmem %s2917_s0, %s2082_s7  ;;  %s1702_s22 = scalar_lea.hbm %s2930_s13, %s2079_s23 }
  0x2c   : > { %v2569_v0 = vld [vmem:[%s488_s14] sm:$0xff]  ;;  %v2571_v1 = vld [vmem:[%s488_s14 + $0x8] sm:$0xff]  ;;  %v2581_v6 = vld [vmem:[%s488_s14 + $0x10] sm:$0xff]  ;;  %vm2604_vm2 = vcmp.ge.s32.totalorder %v511_v17, 1  ;;  %v525_v31 = vand.u32 15, %v2612_v26  ;;  %v539_v45 = vand.u32 15, %v2633_v42  ;;  %974 = vmatpush.bf16.msra.mxu2 %v2097_v50 }
  0x2d   : > { %v2213_v2 = vpack.i.bf16 %v2571_v1, %v2569_v0  ;;  %v2575_v3 = vld [vmem:[%s488_s14 + $0x20] sm:$0xff]  ;;  %v2577_v4 = vld [vmem:[%s488_s14 + $0x28] sm:$0xff]  ;;  %v2583_v7 = vld [vmem:[%s488_s14 + $0x18] sm:$0xff]  ;;  %v612_v16 = vrot.slane %v2569_v0, 7  ;;  %v613_v18 = vrot.slane %v2571_v1, 7  ;;  %v615_v30 = vrot.slane %v2581_v6, 7  ;;  %945 = vmatpush.bf16.msra.mxu1 %v2089_v51 }
  0x2e   : > { %v2223_v5 = vpack.i.bf16 %v2577_v4, %v2575_v3  ;;  %v2585_v8 = vld [vmem:[%s488_s14 + $0x30] sm:$0xff]  ;;  %v2587_v9 = vld [vmem:[%s488_s14 + $0x38] sm:$0xff]  ;;  %v2218_v10 = vpack.i.bf16 %v2583_v7, %v2581_v6  ;;  %v617_v32 = vrot.slane %v2583_v7, 7  ;;  %vm2623_vm5 = vcmp.ge.s32.totalorder %v525_v31, 1  ;;  %vm1878_vm10 = vmpackc.low %vm2407_vm9, %vm2604_vm2  ;;  %s483_s9 = scalar_lea.vmem [#allocation8], %s1807_s15  ;;  %s1706_s25 = sshll.u32 %s1702_s22, 4  ;;  %s1707_s25 = int_to_ptr.hbm [resolvable:$true] %s1706_s25 }
  0x2f   : > { %2214 = vrot.lane.b32.xlu0 %v2213_v2, %s2406_s17  ;;  %v2228_v11 = vpack.i.bf16 %v2587_v9, %v2585_v8  ;;  %v635_v19 = vsel %vm611_vm1, 0.0, %v612_v16  ;;  %v614_v22 = vsel %vm611_vm1, %v612_v16, %v613_v18  ;;  %v616_v34 = vsel %vm611_vm1, %v613_v18, %v615_v30  ;;  %vm1881_vm11 = vmpackc.low %vm2407_vm9, %vm2623_vm5  ;;  %v2771_v16 = vld [vmem:[%s2921_s4] ss:$0 sm:$0xff]  ;;  %v2138_v42 = vld [vmem:[#allocation7 + $0x38] sm:$0xff]  ;;  %s1704_s7 = sshll.u32 %s483_s9, 4  ;;  %s1692_s27 = scalar_lea.sflag [#allocation4], %s481_s20  ;;  %s1705_s7 = int_to_ptr.vmem [resolvable:$true] %s1704_s7 }
  0x30   : > { %2224 = vrot.lane.b32.xlu1 %v2223_v5, %s2406_s17  ;;  %v660_v23 = vsel %vm2604_vm2, %v635_v19, 0.0  ;;  %v618_v38 = vsel %vm611_vm1, %v615_v30, %v617_v32  ;;  %v662_v39 = vsel %vm2623_vm5, %v616_v34, 0.0  ;;  %v619_v44 = vrot.slane %v2575_v3, 7  ;;  %975 = vmatpush.bf16.msra.mxu2 %v2096_v58  ;;  %v1014_v30 = vld [vmem:[%s2922_s5] sm:$0x3]  ;;  %v2092_v34 = vld [vmem:[%s2920_s3 + $0x48] sm:$0xff] }
  0x31   : > { %v621_v48 = vrot.slane %v2577_v4, 7  ;;  %vm2654_vm6 = vcmp.ge.s32.totalorder %v539_v45, 1  ;;  %946 = vmatpush.bf16.msra.mxu1 %v2088_v59  ;;  %v2676_v2 = vadd.s32 48, %v2596_v15  ;;  %v625_v12 = vrot.slane %v2587_v9, 7  ;;  %s2343_s29 = sshra.s32 %s1707_s25, 4  ;;  %s2349_s23 = scalar_lea.hbm %s2930_s13, 8  ;;  %s2344_s29 = int_to_ptr.hbm [resolvable:$true] %s2343_s29 }
  0x32   : > { %v620_v52 = vsel %vm611_vm1, %v617_v32, %v619_v44  ;;  %v1033_v32 = vsel %vm1031_vm8, %v1014_v30, 0  ;;  %vm1884_vm12 = vmpackc.low %vm2407_vm9, %vm2654_vm6  ;;  %vm1112_vm14 = vcmp.ge.s32.totalorder %v511_v17, 2  ;;  %vm1114_vm0 = vcmp.ge.s32.totalorder %v525_v31, 2  ;;  %s2345_s14 = scalar_lea.hbm %s2344_s29, 4  ;;  %p2350_p3 = scmp.lt.s32.totalorder %s2344_s29, %s2930_s13 }
  0x33   : > { %v622_v56 = vsel %vm611_vm1, %v619_v44, %v621_v48  ;;  %v664_v57 = vsel %vm2654_vm6, %v620_v52, 0.0  ;;  %1042 = vmatpush.bf16.msra.mxu3 %v1033_v32  ;;  %v1012_v44 = vpack.c.bf16 %v2577_v4, %v2575_v3  ;;  %vm2793_vm15 = vmpackc.low %vm2407_vm9, %vm1112_vm14  ;;  %p2346_p0 = scmp.ne.s32.totalorder %s2344_s29, %s2345_s14  ;;  %p2351_p4 = scmp.lt.s32.totalorder %s2349_s23, %s2345_s14 }
  0x34   : > { %976 = vmatpush.bf16.msra.mxu2 %v2095_v62  ;;  %vm2812_vm2 = vmpackc.low %vm2407_vm9, %vm1114_vm0 }
  0x35   : > { %947 = vmatpush.bf16.msra.mxu1 %v2087_v63  ;;  %p2347_p1 = pnand %p2346_p0, %p2516_p5  ;;  %p2352_p7 = por %p2351_p4, %p2350_p3 }
  0x37   : > { %2219 = vrot.lane.b32.xlu0 %v2218_v10, %s2406_s17  ;;  %v623_v10 = vrot.slane %v2585_v8, 7  ;;  %p2348_p2 = pneg %p2347_p1 }
  0x38   : > { %2229 = vrot.lane.b32.xlu1 %v2228_v11, %s2406_s17  ;;  %v553_v11 = vand.u32 15, %v2676_v2  ;;  %v2124_v2 = vld [vmem:[#allocation5 + $0x48] sm:$0xff] }
  0x39   : > { %v624_v14 = vsel %vm611_vm1, %v621_v48, %v623_v10  ;;  %p2353_p8 = pnand %p2352_p7, %p2348_p2 }
  0x3a   : > { %vm2685_vm7 = vcmp.ge.s32.totalorder %v553_v11, 1  ;;  %vm1118_vm5 = vcmp.ge.s32.totalorder %v553_v11, 2  ;;  %v2116_v11 = vld [vmem:[#allocation5 + $0x8] sm:$0xff] }
  0x3b   : > { %vm1887_vm13 = vmpackc.low %vm2407_vm9, %vm2685_vm7 }
  0x3c   : > { %vm2848_vm6 = vmpackc.low %vm2407_vm9, %vm1118_vm5 }
  0xa1   : > { %v2215_v21 = vpop.permute.xlu0 %2214 }
  0xa2   : > { %v2217_v24 = vunpack.i.h.bf16 %v2215_v21  ;;  %v2216_v25 = vunpack.i.l.bf16 %v2215_v21  ;;  %v2225_v49 = vpop.permute.xlu1 %2224  ;;  %v626_v21 = vsel %vm611_vm1, %v623_v10, %v625_v12  ;;  %v2113_v12 = vld [vmem:[#allocation2 + $0x70] sm:$0xff] }
  0xa3   : > { %v2227_v54 = vunpack.i.h.bf16 %v2225_v49  ;;  %v2226_v55 = vunpack.i.l.bf16 %v2225_v49 }
  0xa4   : > { %v693_v27 = vsel %vm692_vm3, %v660_v23, %v2216_v25  ;;  %v694_v28 = vsel %vm692_vm3, %v614_v22, %v2217_v24  ;;  %v666_v22 = vsel %vm2685_vm7, %v624_v14, 0.0  ;;  %vm1606_vm7 = vcmask 1042432  }
  0xa5   : > { %v701_v29 = vpack.c.bf16 %v694_v28, %v693_v27  ;;  %v697_v60 = vsel %vm692_vm3, %v664_v57, %v2226_v55  ;;  %v698_v61 = vsel %vm692_vm3, %v622_v56, %v2227_v54  ;;  %v2094_v27 = vld [vmem:[%s2920_s3 + $0x58] sm:$0xff]  ;;  %v1013_v55 = vpack.c.bf16 %v2587_v9, %v2585_v8 }
  0xa6   : > { %v703_v5 = vpack.c.bf16 %v698_v61, %v697_v60  ;;  %977 = vmatpush.bf16.msra.mxu2 %v2094_v27  ;;  %v2086_v28 = vld [vmem:[%s2920_s3 + $0x18] sm:$0xff] }
  0xa7   : > { %1810 = vmatmul.msk.bf16.vlgmr.msra.gmra.mxu0 %vm710_vm4, %v701_v29  ;;  %v2093_v29 = vld [vmem:[%s2920_s3 + $0x50] sm:$0xff]  ;;  %948 = vmatpush.bf16.msra.mxu1 %v2086_v28  ;;  %v2114_v9 = vld [vmem:[#allocation2 + $0x78] sm:$0xff] }
  0xa8   : > { %1313 = vmatpush.bf16.msrb.mxu3 %v2114_v9 }
  0xa9   : > { %v2220_v33 = vpop.permute.xlu0 %2219 }
  0xaa   : > { %v2222_v36 = vunpack.i.h.bf16 %v2220_v33  ;;  %v2221_v37 = vunpack.i.l.bf16 %v2220_v33  ;;  %v2230_v13 = vpop.permute.xlu1 %2229  ;;  %978 = vmatpush.bf16.msra.mxu2 %v2093_v29  ;;  %v2085_v33 = vld [vmem:[%s2920_s3 + $0x10] sm:$0xff] }
  0xab   : > { %v2232_v18 = vunpack.i.h.bf16 %v2230_v13  ;;  %v2231_v19 = vunpack.i.l.bf16 %v2230_v13  ;;  %949 = vmatpush.bf16.msra.mxu1 %v2085_v33  ;;  %v2105_v13 = vld [vmem:[#allocation2 + $0x30] sm:$0xff] }
  0xac   : > { %v695_v40 = vsel %vm692_vm3, %v662_v39, %v2221_v37  ;;  %v696_v41 = vsel %vm692_vm3, %v618_v38, %v2222_v36  ;;  %v1010_v36 = vpack.c.bf16 %v2571_v1, %v2569_v0  ;;  %v2084_v37 = vld [vmem:[%s2920_s3 + $0x8] sm:$0xff]  ;;  %v2091_v38 = vld [vmem:[%s2920_s3 + $0x40] sm:$0xff]  ;;  %v1011_v0 = vpack.c.bf16 %v2583_v7, %v2581_v6  ;;  %1314 = vmatpush.bf16.msrb.mxu3 %v2113_v12 }
  0xad   : > { %v702_v43 = vpack.c.bf16 %v696_v41, %v695_v40  ;;  %v699_v23 = vsel %vm692_vm3, %v666_v22, %v2231_v19  ;;  %v700_v24 = vsel %vm692_vm3, %v626_v21, %v2232_v18  ;;  %v2083_v39 = vld [vmem:[%s2920_s3] sm:$0xff]  ;;  %v2112_v19 = vld [vmem:[#allocation2 + $0x68] sm:$0xff] }
  0xae   : > { %v704_v25 = vpack.c.bf16 %v700_v24, %v699_v23  ;;  %979 = vmatpush.bf16.msra.mxu2 %v2092_v34  ;;  %1890 = vmatmul.msk.bf16.vlgmr.msra.gmra.mxu3 %vm692_vm3, %v1010_v36  ;;  %v2732_v1 = vld [vmem:[%s2919_s2] ss:$0 sm:$0xff]  ;;  %v2104_v21 = vld [vmem:[#allocation2 + $0x28] sm:$0xff]  ;;  %v2110_v34 = vld [vmem:[#allocation2 + $0x58] sm:$0xff] }
  0xaf   : > { %950 = vmatpush.bf16.msra.mxu1 %v2084_v37  ;;  %v2111_v24 = vld [vmem:[#allocation2 + $0x60] sm:$0xff]  ;;  %v2102_v36 = vld [vmem:[#allocation2 + $0x18] sm:$0xff] }
  0xb0   : > { %1315 = vmatpush.bf16.msrb.mxu3 %v2112_v19 }
  0xb2   : > { %980 = vmatpush.bf16.msra.mxu2 %v2091_v38 }
  0xb3   : > { %951 = vmatpush.bf16.msra.mxu1 %v2083_v39 }
  0xb4   : > { %1316 = vmatpush.bf16.msrb.mxu3 %v2111_v24 }
  0xb7   : > { %1811 = vmatmul.msk.bf16.gmra.mxu0 %vm710_vm4, %v702_v43 }
  0xb8   : > { %1317 = vmatpush.bf16.msrb.mxu3 %v2110_v34 }
  0xbe   : > { %1891 = vmatmul.msk.bf16.gmra.mxu3 %vm692_vm3, %v1011_v0 }
  0xc7   : > { %1812 = vmatmul.msk.bf16.gmra.mxu0 %vm710_vm4, %v703_v5  ;;  %v2106_v5 = vld [vmem:[#allocation2 + $0x38] sm:$0xff] }
  0xc8   : > { %1284 = vmatpush.bf16.msrb.mxu0 %v2106_v5 }
  0xcc   : > { %1285 = vmatpush.bf16.msrb.mxu0 %v2105_v13 }
  0xce   : > { %1892 = vmatmul.msk.bf16.gmra.mxu3 %vm692_vm3, %v1012_v44 }
  0xd0   : > { %1286 = vmatpush.bf16.msrb.mxu0 %v2104_v21 }
  0xd7   : > { %1813 = vmatmul.msk.bf16.gmra.mxu0 %vm710_vm4, %v704_v25  ;;  %v2103_v25 = vld [vmem:[#allocation2 + $0x20] sm:$0xff] }
  0xd8   : > { %1287 = vmatpush.bf16.msrb.mxu0 %v2103_v25 }
  0xdc   : > { %1288 = vmatpush.bf16.msrb.mxu0 %v2102_v36 }
  0xde   : > { %1893 = vmatmul.msk.bf16.gmra.mxu3 %vm692_vm3, %v1013_v55  ;;  %vm1116_vm3 = vcmp.ge.s32.totalorder %v539_v45, 2 }
  0xdf   : > { %vm2831_vm4 = vmpackc.low %vm2407_vm9, %vm1116_vm3 }
 0x124   : > { %v736_v40 = vpop.f32.mrf.mxu0 }
 0x125   : > { %v737_v41 = vadd.f32 %v2732_v1, %v736_v40 }
 0x127   : > { %v756_v43 = vmax.f32 %v737_v41, 0.0 }
 0x129   : > { %v772_v6 = vrot.slane %v756_v43, 7 }
 0x12b   : > { %v795_v51 = vsel %vm611_vm1, 0.0, %v772_v6 }
 0x12c   : > { %v738_v46 = vpop.f32.mrf.mxu0 }
 0x12d   : > { %v739_v47 = vadd.f32 %v2732_v1, %v738_v46 }
 0x12f   : > { %v757_v7 = vmax.f32 %v739_v47, 0.0 }
 0x131   : > { %v773_v48 = vrot.slane %v757_v7, 7  ;;  %v805_v49 = vpack.c.bf16 %v757_v7, %v756_v43  ;;  %v2101_v7 = vld [vmem:[#allocation2 + $0x10] sm:$0xff] }
 0x132   : > { %1289 = vmatpush.bf16.msrb.mxu0 %v2101_v7 }
 0x133   : > { %981 = vmatmul.bf16.vlgmr.msra.gmra.mxu2 %v805_v49  ;;  %v774_v50 = vsel %vm611_vm1, %v772_v6, %v773_v48  ;;  %v2109_v6 = vld [vmem:[#allocation2 + $0x50] sm:$0xff]  ;;  %v2107_v49 = vld [vmem:[#allocation2 + $0x40] sm:$0xff] }
 0x134   : > { %v741_v3 = vpop.f32.mrf.mxu0  ;;  %v1879_v4 = vpack.c.bf16 %v774_v50, %v795_v51  ;;  %1318 = vmatpush.bf16.msrb.mxu3 %v2109_v6  ;;  %v2099_v50 = vld [vmem:[#allocation2] sm:$0xff]  ;;  %v1044_v51 = vpop.f32.mrf.mxu3 }
 0x135   : > { %v742_v52 = vadd.f32 %v2732_v1, %v741_v3 }
 0x136   : > { %1880 = vmatmul.msk.bf16.vlgmr.msra.gmra.mxu1 %vm1878_vm10, %v1879_v4 }
 0x137   : > { %v758_v54 = vmax.f32 %v742_v52, 0.0 }
 0x139   : > { %v775_v58 = vrot.slane %v758_v54, 7 }
 0x13b   : > { %v776_v61 = vsel %vm611_vm1, %v773_v48, %v775_v58  ;;  %v2100_v48 = vld [vmem:[#allocation2 + $0x8] sm:$0xff] }
 0x13c   : > { %v743_v56 = vpop.f32.mrf.mxu0  ;;  %1290 = vmatpush.bf16.msrb.mxu0 %v2100_v48  ;;  %v1046_v3 = vpop.f32.mrf.mxu3 }
 0x13d   : > { %v744_v57 = vadd.f32 %v2732_v1, %v743_v56 }
 0x13f   : > { %v759_v59 = vmax.f32 %v744_v57, 0.0 }
 0x140   : > { %1291 = vmatpush.bf16.msrb.mxu0 %v2099_v50 }
 0x141   : > { %v777_v60 = vrot.slane %v759_v59, 7  ;;  %v807_v20 = vpack.c.bf16 %v759_v59, %v758_v54  ;;  %v2777_v54 = vld [vmem:[%s2923_s6] ss:$0 sm:$0xff] }
 0x142   : > { %v1045_v57 = vadd.f32 %v2777_v54, %v1044_v51  ;;  %v1047_v9 = vadd.f32 %v2777_v54, %v1046_v3 }
 0x143   : > { %986 = vmatmul.bf16.gmra.mxu2 %v807_v20  ;;  %v778_v62 = vsel %vm611_vm1, %v775_v58, %v777_v60 }
 0x144   : > { %v746_v63 = vpop.f32.mrf.mxu0  ;;  %v1882_v8 = vpack.c.bf16 %v778_v62, %v776_v61  ;;  %v1049_v20 = vpop.f32.mrf.mxu3  ;;  %1677 = vmatpush.bf16.msra.mxu0 %v2138_v42 }
 0x145   : > { %v747_v10 = vadd.f32 %v2732_v1, %v746_v63  ;;  %v1050_v25 = vadd.f32 %v2777_v54, %v1049_v20 }
 0x146   : > { %1883 = vmatmul.msk.bf16.gmra.mxu1 %vm1881_vm11, %v1882_v8 }
 0x147   : > { %v760_v14 = vmax.f32 %v747_v10, 0.0 }
 0x149   : > { %v779_v22 = vrot.slane %v760_v14, 7 }
 0x14b   : > { %v780_v29 = vsel %vm611_vm1, %v777_v60, %v779_v22 }
 0x14c   : > { %v748_v18 = vpop.f32.mrf.mxu0  ;;  %v1051_v21 = vpop.f32.mrf.mxu3 }
 0x14d   : > { %v749_v35 = vadd.f32 %v2732_v1, %v748_v18 }
 0x14f   : > { %v761_v23 = vmax.f32 %v749_v35, 0.0 }
 0x151   : > { %v781_v27 = vrot.slane %v761_v23, 7  ;;  %v809_v28 = vpack.c.bf16 %v761_v23, %v760_v14 }
 0x153   : > { %991 = vmatmul.bf16.gmra.mxu2 %v809_v28  ;;  %v782_v30 = vsel %vm611_vm1, %v779_v22, %v781_v27 }
 0x154   : > { %v751_v32 = vpop.f32.mrf.mxu0  ;;  %v1885_v33 = vpack.c.bf16 %v782_v30, %v780_v29  ;;  %v1054_v36 = vpop.f32.mrf.mxu3 }
 0x155   : > { %v752_v37 = vadd.f32 %v2732_v1, %v751_v32  ;;  %v1055_v7 = vadd.f32 %v2777_v54, %v1054_v36 }
 0x156   : > { %1886 = vmatmul.msk.bf16.gmra.mxu1 %vm1884_vm12, %v1885_v33 }
 0x157   : > { %v762_v38 = vmax.f32 %v752_v37, 0.0  ;;  %v1052_v37 = vadd.f32 %v2777_v54, %v1051_v21  ;;  %v2119_v21 = vld [vmem:[#allocation5 + $0x20] sm:$0xff] }
 0x159   : > { %v783_v40 = vrot.slane %v762_v38, 7 }
 0x15b   : > { %v784_v44 = vsel %vm611_vm1, %v781_v27, %v783_v40 }
 0x15c   : > { %v753_v39 = vpop.f32.mrf.mxu0  ;;  %v1056_v26 = vpop.f32.mrf.mxu3 }
 0x15d   : > { %v754_v0 = vadd.f32 %v2732_v1, %v753_v39  ;;  %v2108_v1 = vld [vmem:[#allocation2 + $0x48] sm:$0xff] }
 0x15e   : > { %1319 = vmatpush.bf16.msrb.mxu3 %v2108_v1 }
 0x15f   : > { %v763_v41 = vmax.f32 %v754_v0, 0.0 }
 0x161   : > { %v785_v53 = vrot.slane %v763_v41, 7  ;;  %v811_v43 = vpack.c.bf16 %v763_v41, %v762_v38 }
 0x162   : > { %1320 = vmatpush.bf16.msrb.mxu3 %v2107_v49 }
 0x163   : > { %996 = vmatmul.bf16.gmra.mxu2 %v811_v43  ;;  %v786_v46 = vsel %vm611_vm1, %v783_v40, %v785_v53 }
 0x164   : > { %v1888_v47 = vpack.c.bf16 %v786_v46, %v784_v44 }
 0x166   : > { %1889 = vmatmul.msk.bf16.gmra.mxu1 %vm1887_vm13, %v1888_v47 }
 0x1b3   : > { %v953_v4 = vpop.f32.mrf.mxu1 }
 0x1b4   : > { %v954_v52 = vadd.f32 %v2771_v16, %v953_v4  ;;  %v2130_v4 = vld [vmem:[#allocation5 + $0x78] sm:$0xff] }
 0x1b5   : > { %1555 = vmatpush.bf16.msrb.mxu2 %v2130_v4 }
 0x1b6   : > { %v982_v55 = vpop.f32.mrf.mxu2 }
 0x1b7   : > { %v983_v56 = vadd.f32 %v982_v55, %v954_v52  ;;  %v2122_v52 = vld [vmem:[#allocation5 + $0x38] sm:$0xff] }
 0x1b8   : > { %1530 = vmatpush.bf16.msrb.mxu1 %v2122_v52 }
 0x1b9   : > { %v1002_v58 = vmax.f32 %v983_v56, 0.0 }
 0x1bb   : > { %v955_v59 = vpop.f32.mrf.mxu1  ;;  %v1064_v61 = vadd.f32 %v1045_v57, %v1002_v58  ;;  %v2129_v57 = vld [vmem:[#allocation5 + $0x70] sm:$0xff] }
 0x1bc   : > { %v956_v60 = vadd.f32 %v2771_v16, %v955_v59  ;;  %v2121_v58 = vld [vmem:[#allocation5 + $0x30] sm:$0xff]  ;;  %1556 = vmatpush.bf16.msrb.mxu2 %v2129_v57 }
 0x1bd   : > { %v1072_v8 = vmax.f32 %v1064_v61, 0.0  ;;  %1531 = vmatpush.bf16.msrb.mxu1 %v2121_v58 }
 0x1be   : > { %v984_v62 = vpop.f32.mrf.mxu2 }
 0x1bf   : > { %v985_v63 = vadd.f32 %v984_v62, %v956_v60  ;;  %v1088_v14 = vrot.slane %v1072_v8, 6  ;;  %v1057_v60 = vadd.f32 %v2777_v54, %v1056_v26  ;;  %v2128_v62 = vld [vmem:[#allocation5 + $0x68] sm:$0xff]  ;;  %v2236_v26 = vld [vmem:[%s2925_s8] ss:$0 sm:$0xff] }
 0x1c0   : > { %1557 = vmatpush.bf16.msrb.mxu2 %v2128_v62 }
 0x1c1   : > { %v1003_v5 = vmax.f32 %v985_v63, 0.0  ;;  %v1111_v24 = vsel %vm1031_vm8, 0.0, %v1088_v14  ;;  %v2120_v63 = vld [vmem:[#allocation5 + $0x28] sm:$0xff] }
 0x1c2   : > { %1532 = vmatpush.bf16.msrb.mxu1 %v2120_v63 }
 0x1c3   : > { %v1065_v10 = vadd.f32 %v1047_v9, %v1003_v5  ;;  %v958_v12 = vpop.f32.mrf.mxu1  ;;  %v1059_v5 = vpop.f32.mrf.mxu3 }
 0x1c4   : > { %v959_v13 = vadd.f32 %v2771_v16, %v958_v12 }
 0x1c5   : > { %v2783_v18 = vmax.f32 %v1065_v10, 0.0 }
 0x1c6   : > { %v987_v19 = vpop.f32.mrf.mxu2  ;;  %1533 = vmatpush.bf16.msrb.mxu1 %v2119_v21 }
 0x1c7   : > { %v1089_v35 = vrot.slane %v2783_v18, 6  ;;  %v988_v22 = vadd.f32 %v987_v19, %v959_v13  ;;  %v1145_v23 = vpack.c.bf16 %v2783_v18, %v1072_v8  ;;  %v2127_v19 = vld [vmem:[#allocation5 + $0x60] sm:$0xff] }
 0x1c8   : > { %1558 = vmatpush.bf16.msrb.mxu2 %v2127_v19 }
 0x1c9   : > { %v1004_v27 = vmax.f32 %v988_v22, 0.0  ;;  %1321 = vmatmul.bf16.vlgmr.msrb.gmra.mxu3 %v1145_v23  ;;  %v1090_v28 = vsel %vm1031_vm8, %v1088_v14, %v1089_v35 }
 0x1ca   : > { %v1959_v15 = vpack.c.bf16 %v1090_v28, %v1111_v24  ;;  %v1060_v24 = vadd.f32 %v2777_v54, %v1059_v5 }
 0x1cb   : > { %v960_v17 = vpop.f32.mrf.mxu1  ;;  %v1066_v32 = vadd.f32 %v1050_v25, %v1004_v27 }
 0x1cc   : > { %v961_v30 = vadd.f32 %v2771_v16, %v960_v17  ;;  %1960 = vmatmul.msk.bf16.vlgmr.msrb.gmra.mxu0 %vm2793_vm15, %v1959_v15  ;;  %v2126_v15 = vld [vmem:[#allocation5 + $0x58] sm:$0xff] }
 0x1cd   : > { %v1074_v39 = vmax.f32 %v1066_v32, 0.0  ;;  %v2118_v17 = vld [vmem:[#allocation5 + $0x18] sm:$0xff]  ;;  %1559 = vmatpush.bf16.msrb.mxu2 %v2126_v15 }
 0x1ce   : > { %v989_v33 = vpop.f32.mrf.mxu2  ;;  %1534 = vmatpush.bf16.msrb.mxu1 %v2118_v17 }
 0x1cf   : > { %v990_v34 = vadd.f32 %v989_v33, %v961_v30  ;;  %v1091_v43 = vrot.slane %v1074_v39, 6 }
 0x1d1   : > { %v1005_v38 = vmax.f32 %v990_v34, 0.0  ;;  %v1092_v48 = vsel %vm1031_vm8, %v1089_v35, %v1091_v43  ;;  %v1061_v34 = vpop.f32.mrf.mxu3 }
 0x1d3   : > { %v1067_v0 = vadd.f32 %v1052_v37, %v1005_v38  ;;  %v963_v40 = vpop.f32.mrf.mxu1  ;;  %v2125_v37 = vld [vmem:[#allocation5 + $0x50] sm:$0xff] }
 0x1d4   : > { %v964_v41 = vadd.f32 %v2771_v16, %v963_v40  ;;  %v2117_v38 = vld [vmem:[#allocation5 + $0x10] sm:$0xff]  ;;  %1560 = vmatpush.bf16.msrb.mxu2 %v2125_v37 }
 0x1d5   : > { %v2802_v53 = vmax.f32 %v1067_v0, 0.0  ;;  %v1062_v0 = vadd.f32 %v2777_v54, %v1061_v34  ;;  %1535 = vmatpush.bf16.msrb.mxu1 %v2117_v38 }
 0x1d6   : > { %v992_v44 = vpop.f32.mrf.mxu2 }
 0x1d7   : > { %v1093_v46 = vrot.slane %v2802_v53, 6  ;;  %v993_v47 = vadd.f32 %v992_v44, %v964_v41  ;;  %v1147_v6 = vpack.c.bf16 %v2802_v53, %v1074_v39 }
 0x1d8   : > { %1561 = vmatpush.bf16.msrb.mxu2 %v2124_v2 }
 0x1d9   : > { %v1006_v1 = vmax.f32 %v993_v47, 0.0  ;;  %1326 = vmatmul.bf16.gmra.mxu3 %v1147_v6  ;;  %v1094_v49 = vsel %vm1031_vm8, %v1091_v43, %v1093_v46  ;;  %1536 = vmatpush.bf16.msrb.mxu1 %v2116_v11 }
 0x1da   : > { %v1962_v31 = vpack.c.bf16 %v1094_v49, %v1092_v48  ;;  %v2123_v48 = vld [vmem:[#allocation5 + $0x40] sm:$0xff] }
 0x1db   : > { %v965_v51 = vpop.f32.mrf.mxu1  ;;  %v1068_v55 = vadd.f32 %v1055_v7, %v1006_v1  ;;  %v2115_v49 = vld [vmem:[#allocation5] sm:$0xff]  ;;  %v2132_v7 = vld [vmem:[#allocation7 + $0x8] sm:$0xff] }
 0x1dc   : > { %v966_v3 = vadd.f32 %v2771_v16, %v965_v51  ;;  %1963 = vmatmul.msk.bf16.gmra.mxu0 %vm2812_vm2, %v1962_v31  ;;  %1562 = vmatpush.bf16.msrb.mxu2 %v2123_v48 }
 0x1dd   : > { %v1076_v61 = vmax.f32 %v1068_v55, 0.0  ;;  %1537 = vmatpush.bf16.msrb.mxu1 %v2115_v49 }
 0x1de   : > { %v994_v56 = vpop.f32.mrf.mxu2 }
 0x1df   : > { %v995_v59 = vadd.f32 %v994_v56, %v966_v3  ;;  %v1095_v13 = vrot.slane %v1076_v61, 6 }
 0x1e1   : > { %v1007_v20 = vmax.f32 %v995_v59, 0.0  ;;  %v1096_v27 = vsel %vm1031_vm8, %v1093_v46, %v1095_v13 }
 0x1e3   : > { %v1069_v8 = vadd.f32 %v1057_v60, %v1007_v20  ;;  %v968_v9 = vpop.f32.mrf.mxu1 }
 0x1e4   : > { %v969_v10 = vadd.f32 %v2771_v16, %v968_v9 }
 0x1e5   : > { %v2821_v12 = vmax.f32 %v1069_v8, 0.0 }
 0x1e6   : > { %v997_v14 = vpop.f32.mrf.mxu2 }
 0x1e7   : > { %v1097_v35 = vrot.slane %v2821_v12, 6  ;;  %v998_v22 = vadd.f32 %v997_v14, %v969_v10  ;;  %v1149_v23 = vpack.c.bf16 %v2821_v12, %v1076_v61 }
 0x1e9   : > { %v1008_v25 = vmax.f32 %v998_v22, 0.0  ;;  %1331 = vmatmul.bf16.gmra.mxu3 %v1149_v23  ;;  %v1098_v28 = vsel %vm1031_vm8, %v1095_v13, %v1097_v35 }
 0x1ea   : > { %v1965_v45 = vpack.c.bf16 %v1098_v28, %v1096_v27 }
 0x1eb   : > { %v970_v30 = vpop.f32.mrf.mxu1  ;;  %v1070_v33 = vadd.f32 %v1060_v24, %v1008_v25 }
 0x1ec   : > { %v971_v32 = vadd.f32 %v2771_v16, %v970_v30  ;;  %1966 = vmatmul.msk.bf16.gmra.mxu0 %vm2831_vm4, %v1965_v45 }
 0x1ed   : > { %v1078_v41 = vmax.f32 %v1070_v33, 0.0 }
 0x1ee   : > { %v999_v36 = vpop.f32.mrf.mxu2 }
 0x1ef   : > { %v1000_v39 = vadd.f32 %v999_v36, %v971_v32  ;;  %v1099_v16 = vrot.slane %v1078_v41, 6 }
 0x1f1   : > { %v1009_v40 = vmax.f32 %v1000_v39, 0.0  ;;  %v1100_v6 = vsel %vm1031_vm8, %v1097_v35, %v1099_v16 }
 0x1f3   : > { %v1071_v43 = vadd.f32 %v1062_v0, %v1009_v40 }
 0x1f5   : > { %v2839_v44 = vmax.f32 %v1071_v43, 0.0 }
 0x1f7   : > { %v1101_v46 = vrot.slane %v2839_v44, 6  ;;  %v1151_v47 = vpack.c.bf16 %v2839_v44, %v1078_v41 }
 0x1f9   : > { %1336 = vmatmul.bf16.gmra.mxu3 %v1151_v47  ;;  %v1102_v54 = vsel %vm1031_vm8, %v1099_v16, %v1101_v46 }
 0x1fa   : > { %v1968_v1 = vpack.c.bf16 %v1102_v54, %v1100_v6 }
 0x1fc   : > { %1969 = vmatmul.msk.bf16.gmra.mxu0 %vm2848_vm6, %v1968_v1 }
 0x249   : > { %v1293_v31 = vpop.f32.mrf.mxu0 }
 0x24a   : > { %v1294_v51 = vadd.f32 %v2236_v26, %v1293_v31 }
 0x24c   : > { %v1322_v3 = vpop.f32.mrf.mxu3 }
 0x24d   : > { %v1323_v4 = vadd.f32 %v1322_v3, %v1294_v51 }
 0x24f   : > { %v1342_v56 = vmax.f32 %v1323_v4, 0.0 }
 0x251   : > { %v1295_v52 = vpop.f32.mrf.mxu0  ;;  %v1358_v59 = vrot.slane %v1342_v56, 6 }
 0x252   : > { %v1296_v55 = vadd.f32 %v2236_v26, %v1295_v52 }
 0x253   : > { %v1381_v63 = vsel %vm1031_vm8, 0.0, %v1358_v59 }
 0x254   : > { %v1324_v57 = vpop.f32.mrf.mxu3 }
 0x255   : > { %v1325_v58 = vadd.f32 %v1324_v57, %v1296_v55  ;;  %v2137_v57 = vld [vmem:[#allocation7 + $0x30] sm:$0xff] }
 0x256   : > { %1678 = vmatpush.bf16.msra.mxu0 %v2137_v57 }
 0x257   : > { %v1343_v60 = vmax.f32 %v1325_v58, 0.0 }
 0x259   : > { %v1359_v20 = vrot.slane %v1343_v60, 6  ;;  %v1391_v61 = vpack.c.bf16 %v1343_v60, %v1342_v56  ;;  %v1298_v62 = vpop.f32.mrf.mxu0  ;;  %v2135_v60 = vld [vmem:[#allocation7 + $0x20] sm:$0xff] }
 0x25a   : > { %v1299_v9 = vadd.f32 %v2236_v26, %v1298_v62 }
 0x25b   : > { %v1360_v8 = vsel %vm1031_vm8, %v1358_v59, %v1359_v20  ;;  %1563 = vmatmul.bf16.vlgmr.msrb.gmra.mxu2 %v1391_v61  ;;  %v2134_v61 = vld [vmem:[#allocation7 + $0x18] sm:$0xff] }
 0x25c   : > { %v1327_v5 = vpop.f32.mrf.mxu3  ;;  %v2035_v10 = vpack.c.bf16 %v1360_v8, %v1381_v63 }
 0x25d   : > { %v1328_v13 = vadd.f32 %v1327_v5, %v1299_v9  ;;  %v2133_v9 = vld [vmem:[#allocation7 + $0x10] sm:$0xff] }
 0x25e   : > { %2036 = vmatmul.msk.bf16.vlgmr.msrb.gmra.mxu1 %vm2793_vm15, %v2035_v10 }
 0x25f   : > { %v1344_v21 = vmax.f32 %v1328_v13, 0.0 }
 0x261   : > { %v1300_v14 = vpop.f32.mrf.mxu0  ;;  %v1361_v23 = vrot.slane %v1344_v21, 6 }
 0x262   : > { %v1301_v19 = vadd.f32 %v2236_v26, %v1300_v14 }
 0x263   : > { %v1362_v15 = vsel %vm1031_vm8, %v1359_v20, %v1361_v23 }
 0x264   : > { %v1329_v35 = vpop.f32.mrf.mxu3 }
 0x265   : > { %v1330_v22 = vadd.f32 %v1329_v35, %v1301_v19  ;;  %v2131_v19 = vld [vmem:[#allocation7] sm:$0xff] }
 0x266   : > { %v2237_v35 = vld [vmem:[%s2927_s10] ss:$0 sm:$0xff] }
 0x267   : > { %v1345_v24 = vmax.f32 %v1330_v22, 0.0 }
 0x269   : > { %v1363_v25 = vrot.slane %v1345_v24, 6  ;;  %v1303_v27 = vpop.f32.mrf.mxu0  ;;  %v1393_v28 = vpack.c.bf16 %v1345_v24, %v1344_v21 }
 0x26a   : > { %v1304_v45 = vadd.f32 %v2236_v26, %v1303_v27 }
 0x26b   : > { %1567 = vmatmul.bf16.gmra.mxu2 %v1393_v28  ;;  %v1364_v17 = vsel %vm1031_vm8, %v1361_v23, %v1363_v25 }
 0x26c   : > { %v1332_v30 = vpop.f32.mrf.mxu3  ;;  %v2038_v29 = vpack.c.bf16 %v1364_v17, %v1362_v15 }
 0x26d   : > { %v1333_v32 = vadd.f32 %v1332_v30, %v1304_v45 }
 0x26e   : > { %2039 = vmatmul.msk.bf16.gmra.mxu1 %vm2812_vm2, %v2038_v29 }
 0x26f   : > { %v1346_v36 = vmax.f32 %v1333_v32, 0.0 }
 0x271   : > { %v1305_v33 = vpop.f32.mrf.mxu0  ;;  %v1365_v39 = vrot.slane %v1346_v36, 6 }
 0x272   : > { %v1306_v34 = vadd.f32 %v2236_v26, %v1305_v33 }
 0x273   : > { %v1366_v46 = vsel %vm1031_vm8, %v1363_v25, %v1365_v39 }
 0x274   : > { %v1334_v37 = vpop.f32.mrf.mxu3 }
 0x275   : > { %v1335_v38 = vadd.f32 %v1334_v37, %v1306_v34 }
 0x277   : > { %v1347_v0 = vmax.f32 %v1335_v38, 0.0 }
 0x279   : > { %v1367_v40 = vrot.slane %v1347_v0, 6  ;;  %v1308_v41 = vpop.f32.mrf.mxu0  ;;  %v1395_v43 = vpack.c.bf16 %v1347_v0, %v1346_v36 }
 0x27a   : > { %v1309_v16 = vadd.f32 %v2236_v26, %v1308_v41 }
 0x27b   : > { %1571 = vmatmul.bf16.gmra.mxu2 %v1395_v43  ;;  %v1368_v47 = vsel %vm1031_vm8, %v1365_v39, %v1367_v40 }
 0x27c   : > { %v1337_v6 = vpop.f32.mrf.mxu3  ;;  %v2041_v50 = vpack.c.bf16 %v1368_v47, %v1366_v46 }
 0x27d   : > { %v1338_v54 = vadd.f32 %v1337_v6, %v1309_v16 }
 0x27e   : > { %2042 = vmatmul.msk.bf16.gmra.mxu1 %vm2831_vm4, %v2041_v50 }
 0x27f   : > { %v1348_v11 = vmax.f32 %v1338_v54, 0.0 }
 0x281   : > { %v1310_v1 = vpop.f32.mrf.mxu0  ;;  %v1369_v31 = vrot.slane %v1348_v11, 6 }
 0x282   : > { %v1311_v2 = vadd.f32 %v2236_v26, %v1310_v1  ;;  %v2136_v26 = vld [vmem:[#allocation7 + $0x28] sm:$0xff] }
 0x283   : > { %v1370_v52 = vsel %vm1031_vm8, %v1367_v40, %v1369_v31  ;;  %1679 = vmatpush.bf16.msra.mxu0 %v2136_v26 }
 0x284   : > { %v1339_v48 = vpop.f32.mrf.mxu3 }
 0x285   : > { %v1340_v49 = vadd.f32 %v1339_v48, %v1311_v2 }
 0x287   : > { %v1349_v51 = vmax.f32 %v1340_v49, 0.0  ;;  %1680 = vmatpush.bf16.msra.mxu0 %v2135_v60 }
 0x289   : > { %v1371_v3 = vrot.slane %v1349_v51, 6  ;;  %v1397_v4 = vpack.c.bf16 %v1349_v51, %v1348_v11 }
 0x28b   : > { %1575 = vmatmul.bf16.gmra.mxu2 %v1397_v4  ;;  %v1372_v55 = vsel %vm1031_vm8, %v1369_v31, %v1371_v3  ;;  %1681 = vmatpush.bf16.msra.mxu0 %v2134_v61 }
 0x28c   : > { %v2044_v56 = vpack.c.bf16 %v1372_v55, %v1370_v52 }
 0x28e   : > { %2045 = vmatmul.msk.bf16.gmra.mxu1 %vm2848_vm6, %v2044_v56 }
 0x28f   : > { %1682 = vmatpush.bf16.msra.mxu0 %v2133_v9 }
 0x293   : > { %1683 = vmatpush.bf16.msra.mxu0 %v2132_v7 }
 0x297   : > { %1684 = vmatpush.bf16.msra.mxu0 %v2131_v19 }
 0x2db   : > { %v1539_v58 = vpop.f32.mrf.mxu1 }
 0x2de   : > { %v1564_v59 = vpop.f32.mrf.mxu2 }
 0x2e3   : > { %v1540_v20 = vpop.f32.mrf.mxu1 }
 0x2e4   : > { %v1541_v25 = vadd.f32 %v2237_v35, %v1540_v20 }
 0x2e6   : > { %v1565_v62 = vpop.f32.mrf.mxu2 }
 0x2e7   : > { %v1566_v15 = vadd.f32 %v1565_v62, %v1541_v25 }
 0x2e9   : > { %v1580_v32 = vmax.f32 %v1566_v15, 0.0 }
 0x2eb   : > { %v1543_v63 = vpop.f32.mrf.mxu1  ;;  %v1584_v38 = vadd.f32 %v1580_v32, %v2783_v18 }
 0x2ed   : > { %v1588_v43 = vmax.f32 %v1584_v38, 0.0 }
 0x2ee   : > { %v1568_v8 = vpop.f32.mrf.mxu2 }
 0x2ef   : > { %v1593_v50 = vrot.slane %v1588_v43, 7 }
 0x2f3   : > { %v1544_v5 = vpop.f32.mrf.mxu1 }
 0x2f4   : > { %v1545_v23 = vadd.f32 %v2237_v35, %v1544_v5 }
 0x2f6   : > { %v1569_v10 = vpop.f32.mrf.mxu2 }
 0x2f7   : > { %v1570_v27 = vadd.f32 %v1569_v10, %v1545_v23 }
 0x2f9   : > { %v1581_v30 = vmax.f32 %v1570_v27, 0.0 }
 0x2fb   : > { %v1547_v13 = vpop.f32.mrf.mxu1  ;;  %v1585_v33 = vadd.f32 %v1581_v30, %v2802_v53 }
 0x2fd   : > { %v1589_v0 = vmax.f32 %v1585_v33, 0.0 }
 0x2fe   : > { %v1572_v14 = vpop.f32.mrf.mxu2 }
 0x2ff   : > { %v1596_v46 = vrot.slane %v1589_v0, 6 }
 0x303   : > { %v1548_v21 = vpop.f32.mrf.mxu1 }
 0x304   : > { %v1549_v24 = vadd.f32 %v2237_v35, %v1548_v21 }
 0x306   : > { %v1573_v22 = vpop.f32.mrf.mxu2 }
 0x307   : > { %v1574_v45 = vadd.f32 %v1573_v22, %v1549_v24 }
 0x309   : > { %v1582_v29 = vmax.f32 %v1574_v45, 0.0 }
 0x30b   : > { %v1551_v28 = vpop.f32.mrf.mxu1  ;;  %v1586_v36 = vadd.f32 %v1582_v29, %v2821_v12  ;;  %v1604_v12 = vsel %vm611_vm1, %v1593_v50, %v1596_v46 }
 0x30d   : > { %v1590_v41 = vmax.f32 %v1586_v36, 0.0 }
 0x30e   : > { %v1576_v17 = vpop.f32.mrf.mxu2 }
 0x30f   : > { %v1599_v6 = vrot.slane %v1590_v41, 5 }
 0x311   : > { %v1605_v18 = vsel %vm1031_vm8, %v1604_v12, %v1599_v6 }
 0x313   : > { %v1552_v34 = vpop.f32.mrf.mxu1 }
 0x314   : > { %v1553_v37 = vadd.f32 %v2237_v35, %v1552_v34 }
 0x316   : > { %v1577_v39 = vpop.f32.mrf.mxu2 }
 0x317   : > { %v1578_v40 = vadd.f32 %v1577_v39, %v1553_v37 }
 0x319   : > { %v1583_v16 = vmax.f32 %v1578_v40, 0.0 }
 0x31b   : > { %v1587_v47 = vadd.f32 %v1583_v16, %v2839_v44  ;;  %v2238_v44 = vld [vmem:[%s2929_s12] ss:$0 sm:$0xff] }
 0x31d   : > { %v1591_v53 = vmax.f32 %v1587_v47, 0.0 }
 0x31f   : > { %v1602_v54 = vrot.slane %v1591_v53, 4 }
 0x321   : > { %v1607_v1 = vsel %vm1606_vm7, %v1605_v18, %v1602_v54 }
 0x322   : > { %v1608_v2 = vpack.c.bf16 %v1607_v1, %v1607_v1 }
 0x324   : > { %1685 = vmatmul.bf16.vlgmr.msra.gmra.mxu0 %v1608_v2 }
 0x3a1   : > { %v1686_v11 = vpop.f32.mrf.mxu0 }
 0x3a2   : > { %v1687_v48 = vadd.f32 %v2238_v44, %v1686_v11 }
 0x3a4   : > { %1690 = vst [vmem:[%s483_s9] sm:$0xf] %v1687_v48 }
 0x3a5   : > { %2356 = shalt.err (!%p2353_p8)
}
 0x3a6   : > { %2151 = dma.vmem_to_hbm [thread:$0]  (%p2516_p5), %s1705_s7, 64, %s1707_s25, %s1692_s27  }
 0x3a9   : > { %v1688_v49 = vpop.f32.mrf.mxu0 }
 0x3aa PF: > { %s2965_s20 = sld [smem:[#allocation12_spill]]  ;;  %p2173_p9 = scmp.ge.s32.totalorder %s2399_s28, 2 }
 0x3ac   : > { %p2164_p10 = pnand %p2173_p9, %p2520_p6 }
 0x3ae   : > { %p2165_p11 = pneg %p2164_p10 }
 0x3b0   : > { %s1718_s22 = sand.u32 1, %s2965_s20  }
 0x3b1   : > { %s1719_s24 = scalar_lea.sflag [#allocation4], %s1718_s22 }
 0x3b2   : > { %2382 = dma.done.wait (%p2165_p11), %s1719_s24, 64  }
 0x3b3   : > { %2384 = vsyncadd (%p2165_p11), %s1719_s24, 4294967232  ;;  %s2967_s28 = sld [smem:[#allocation14_spill]]  ;;  %s2970_s25 = smov %s2391_s26 }
 0x3b4   : > { %s2968_s30 = sld [smem:[#allocation13_spill]] }
 0x3b5   : > { %s2969_s27 = sld [smem:[#allocation15_spill]] }
 0x3b9   : > { %p25_p12 = scmp.ge.s32.totalorder %s2967_s28, 4  }
 0x3ba   : > { %s2971_s26 = smov %s2968_s30 }
 0x3bb   :  { %27 = sbr.rel (!%p25_p12) target bundleno = 8 (0x8), region = 120 }
 0x3c0   :  { %1725 = vsyncpa [#allocation3], 1 }
 0x3c1   :  { %1727 = vsyncpa [#allocation3 + $0x1], 1 }
 0x3c2   :  { %1728 = vsyncpa [#allocation6], 1 }
 0x3c3   :  { %1729 = vsyncpa [#allocation4], 1 }
 0x3c4   :  { %1731 = vsyncpa [#allocation4 + $0x1], 1 }

</bundles_post_ra>
